<compile_context>
chip_gen: v5e
topology: v5e:2x2
jax: 0.10.0
libtpu: 0.0.40
codegen_flags: <defaults>
</compile_context>

<pallas_src>
import jax
import jax.numpy as jnp
import numpy as np
from jax.experimental import pallas as pl
from jax.experimental.pallas import tpu as pltpu

SIGMA = 0.2

# ---- model sizes (small, consistent with a toy forward) ----
B, C, T = 2, 4, 16          # batch, channels, time points
N = B * C * T               # total observed points (lane axis) = 128
PPB = C * T                 # points per batch sample = 64
D_IN = 32                   # encoder input feature dim (stand-in for cconv output)
H_ENC = 32                  # encoder hidden
LATENT = 8                  # latent dim
H_DEC = 32                  # decoder hidden


def pvae_kernel(bp_ref, xf_ref, eps_t_ref, w1_ref, wmulv_t_ref, wd1_t_ref,
                colp_ref, rowp_ref, loss_ref):
    f32 = jnp.float32

    # --- unpack the lane-dense [B+3, N] bundle: selector rows, data, mask, time ---
    sel = bp_ref[0:B, :]                  # [B, N] one-hot batch selector
    data = bp_ref[B:B + 1, :]             # [1, N]
    mask = bp_ref[B + 1:B + 2, :]         # [1, N]
    t_row = bp_ref[B + 2:B + 3, :]        # [1, N]

    xf = xf_ref[...]                      # [B, D_IN]
    eps_t = eps_t_ref[...]                # [LATENT, B]

    # --- unpack small params (sublane / offset-0 slices only) ---
    b1 = rowp_ref[0:1, :]                 # [1, H_ENC]
    wd2_row = rowp_ref[1:2, :]            # [1, H_DEC]   (wd2^T)
    bd2 = rowp_ref[2:3, 0:1]              # [1, 1]
    bmulv_col = colp_ref[0:2 * LATENT, :]                    # [2L, 1]  (bmu; blv)^T
    bd1_col = colp_ref[2 * LATENT:2 * LATENT + H_DEC, :]     # [H_DEC, 1]
    wt_col = colp_ref[2 * LATENT + H_DEC:, :]                # [H_DEC, 1]

    # ---------------- encoder ----------------
    h = jnp.maximum(
        jnp.dot(xf, w1_ref[...], preferred_element_type=f32) + b1, 0.0)   # [B, H_ENC]
    # fused (mu; logvar) head, computed transposed so the split is a sublane slice
    mulv_t = jax.lax.dot_general(
        wmulv_t_ref[...], h, (((1,), (1,)), ((), ())),
        preferred_element_type=f32) + bmulv_col                           # [2L, B]
    mu_t = mulv_t[:LATENT, :]                                             # [L, B]
    logvar_t = mulv_t[LATENT:, :]                                         # [L, B]
    z_t = mu_t + eps_t * jnp.exp(0.5 * logvar_t)                          # [L, B]

    # ------------- decoder (lane-dense: all B*C*T points on lanes) -------------
    zproj_t = jnp.dot(wd1_t_ref[...], z_t, preferred_element_type=f32)    # [H_DEC, B]
    # broadcast the per-batch projection along lanes via a tiny selector matmul,
    # inject the per-point time scalar, add the decoder biases, relu
    hdec = jnp.maximum(
        jnp.dot(zproj_t, sel, preferred_element_type=f32)
        + bd1_col + wt_col * t_row, 0.0)                                  # [H_DEC, N]
    x_recon = jnp.dot(wd2_row, hdec, preferred_element_type=f32) + bd2    # [1, N]

    # ---------------- loss ----------------
    # F.mse_loss(x_recon*mask, data*mask, reduction='none') = (x_recon*mask - data*mask)**2
    diff = x_recon * mask - data * mask
    recon = (1.0 / (2.0 * SIGMA * SIGMA)) * diff * diff * mask            # [1, N]
    recon_sum = jnp.sum(recon, axis=1, keepdims=True)                     # [1,1] = sum_b recon_loss[b]
    kl = 0.5 * (z_t * z_t - logvar_t - eps_t * eps_t)                     # [L, B]
    kl_sum = jnp.sum(jnp.sum(kl, axis=0, keepdims=True),
                     axis=1, keepdims=True)                               # [1,1] = sum_b kl_loss[b]
    loss_ref[...] = (recon_sum + kl_sum) * (1.0 / B)                      # mean over batch


def pvae_loss(data, time, mask, xf, eps, params):
    """Wrapper: lane-dense repacking + parameter fusion, then one pallas_call."""
    f32 = jnp.float32
    # selector: sel[b, n] = 1 iff flattened point n belongs to batch sample b
    sel = (jnp.arange(N)[None, :] // PPB == jnp.arange(B)[:, None]).astype(f32)
    big_pack = jnp.concatenate(
        [sel, data.reshape(1, N), mask.reshape(1, N), time.reshape(1, N)], axis=0)  # [B+3, N]

    # fused / transposed parameter packs (3 arrays instead of 11 small ones)
    wmulv_t = jnp.concatenate([params["wmu"].T, params["wlv"].T], axis=0)   # [2L, H_ENC]
    wd1_t = params["wd1"].T                                                 # [H_DEC, L]
    col_pack = jnp.concatenate(
        [params["bmu"].T, params["blv"].T,
         params["bd1"].T, params["wt"].T], axis=0)                          # [2L+2*H_DEC, 1]
    row_pack = jnp.concatenate(
        [params["b1"], params["wd2"].T,
         jnp.pad(params["bd2"], ((0, 0), (0, H_DEC - 1)))], axis=0)         # [3, H_DEC]
    eps_t = eps.T                                                           # [L, B]

    inputs = (big_pack, xf, eps_t, params["w1"], wmulv_t, wd1_t, col_pack, row_pack)
    out = pl.pallas_call(
        pvae_kernel,
        out_shape=jax.ShapeDtypeStruct((1, 1), jnp.float32),
        in_specs=[pl.BlockSpec(memory_space=pltpu.MemorySpace.VMEM)
                  for _ in inputs],
        out_specs=pl.BlockSpec(memory_space=pltpu.MemorySpace.VMEM),
    )(*inputs)
    return out[0, 0]


def pvae_loss_ref(data, time, mask, xf, eps, params):
    """Pure-JAX reference mirroring the PyTorch forward (original layouts)."""
    h = jnp.maximum(xf @ params["w1"] + params["b1"], 0.0)
    mu = h @ params["wmu"] + params["bmu"]
    logvar = h @ params["wlv"] + params["blv"]
    z = mu + eps * jnp.exp(0.5 * logvar)
    zproj = z @ params["wd1"] + params["bd1"]
    t_flat = time.reshape(B, C * T)
    hdec = jnp.maximum(
        zproj[:, None, :] + t_flat[:, :, None] * params["wt"][0][None, None, :], 0.0)
    x_recon = (hdec.reshape(B * C * T, H_DEC) @ params["wd2"]).reshape(B, C, T) + params["bd2"][0, 0]
    diff = x_recon * mask - data * mask
    recon_loss = ((1.0 / (2.0 * SIGMA ** 2)) * diff * diff * mask).sum(axis=(1, 2))
    kl_loss = 0.5 * (z ** 2 - logvar - eps ** 2).sum(axis=1)
    return recon_loss.mean() + kl_loss.mean()


def init_params(key):
    ks = jax.random.split(key, 8)
    scale = 0.1
    return {
        "w1":  scale * jax.random.normal(ks[0], (D_IN, H_ENC), jnp.float32),
        "b1":  jnp.zeros((1, H_ENC), jnp.float32),
        "wmu": scale * jax.random.normal(ks[1], (H_ENC, LATENT), jnp.float32),
        "bmu": jnp.zeros((1, LATENT), jnp.float32),
        "wlv": scale * jax.random.normal(ks[2], (H_ENC, LATENT), jnp.float32),
        "blv": jnp.zeros((1, LATENT), jnp.float32),
        "wd1": scale * jax.random.normal(ks[3], (LATENT, H_DEC), jnp.float32),
        "bd1": jnp.zeros((1, H_DEC), jnp.float32),
        "wt":  scale * jax.random.normal(ks[4], (1, H_DEC), jnp.float32),
        "wd2": scale * jax.random.normal(ks[5], (H_DEC, 1), jnp.float32),
        "bd2": jnp.zeros((1, 1), jnp.float32),
    }


if __name__ == "__main__":
    key = jax.random.PRNGKey(0)
    k_data, k_time, k_mask, k_xf, k_eps, k_params = jax.random.split(key, 6)

    data = jax.random.normal(k_data, (B, C, T), jnp.float32)
    time = jax.random.uniform(k_time, (B, C, T), jnp.float32)
    mask = (jax.random.uniform(k_mask, (B, C, T)) > 0.3).astype(jnp.float32)
    xf = jax.random.normal(k_xf, (B, D_IN), jnp.float32)      # stand-in for cconv_graph features
    eps = jax.random.normal(k_eps, (B, LATENT), jnp.float32)  # reparameterization noise
    params = init_params(k_params)

    loss = pvae_loss(data, time, mask, xf, eps, params)
    jax.block_until_ready(loss)

    loss_ref = pvae_loss_ref(data, time, mask, xf, eps, params)
    np.testing.assert_allclose(np.array(loss), np.array(loss_ref), rtol=1e-4, atol=1e-4)

    print("KERNEL_OK")
</pallas_src>

<mosaic_0001>
module attributes {stable_mosaic.version = 11 : i64} {
  func.func @pvae_kernel(%arg0: memref<5x128xf32, #tpu.memory_space<vmem>>, %arg1: memref<2x32xf32, #tpu.memory_space<vmem>>, %arg2: memref<8x2xf32, #tpu.memory_space<vmem>>, %arg3: memref<32x32xf32, #tpu.memory_space<vmem>>, %arg4: memref<16x32xf32, #tpu.memory_space<vmem>>, %arg5: memref<32x8xf32, #tpu.memory_space<vmem>>, %arg6: memref<80x1xf32, #tpu.memory_space<vmem>>, %arg7: memref<3x32xf32, #tpu.memory_space<vmem>>, %arg8: memref<1x1xf32, #tpu.memory_space<vmem>>) attributes {dimension_semantics = [], scalar_prefetch = 0 : i64, scratch_operands = 0 : i64, tpu.core_type = #tpu.core_type<tc>} {
    %c0 = arith.constant 0 : index
    %c0_0 = arith.constant 0 : index
    %0 = vector.load %arg0[%c0, %c0_0] : memref<5x128xf32, #tpu.memory_space<vmem>>, vector<2x128xf32>
    %c2 = arith.constant 2 : index
    %c0_1 = arith.constant 0 : index
    %1 = vector.load %arg0[%c2, %c0_1] : memref<5x128xf32, #tpu.memory_space<vmem>>, vector<1x128xf32>
    %c3 = arith.constant 3 : index
    %c0_2 = arith.constant 0 : index
    %2 = vector.load %arg0[%c3, %c0_2] : memref<5x128xf32, #tpu.memory_space<vmem>>, vector<1x128xf32>
    %c4 = arith.constant 4 : index
    %c0_3 = arith.constant 0 : index
    %3 = vector.load %arg0[%c4, %c0_3] : memref<5x128xf32, #tpu.memory_space<vmem>>, vector<1x128xf32>
    %c0_4 = arith.constant 0 : index
    %c0_5 = arith.constant 0 : index
    %4 = vector.load %arg1[%c0_4, %c0_5] : memref<2x32xf32, #tpu.memory_space<vmem>>, vector<2x32xf32>
    %c0_6 = arith.constant 0 : index
    %c0_7 = arith.constant 0 : index
    %5 = vector.load %arg2[%c0_6, %c0_7] : memref<8x2xf32, #tpu.memory_space<vmem>>, vector<8x2xf32>
    %c0_8 = arith.constant 0 : index
    %c0_9 = arith.constant 0 : index
    %6 = vector.load %arg7[%c0_8, %c0_9] : memref<3x32xf32, #tpu.memory_space<vmem>>, vector<1x32xf32>
    %c1 = arith.constant 1 : index
    %c0_10 = arith.constant 0 : index
    %7 = vector.load %arg7[%c1, %c0_10] : memref<3x32xf32, #tpu.memory_space<vmem>>, vector<1x32xf32>
    %c2_11 = arith.constant 2 : index
    %c0_12 = arith.constant 0 : index
    %8 = vector.load %arg7[%c2_11, %c0_12] : memref<3x32xf32, #tpu.memory_space<vmem>>, vector<1x1xf32>
    %c0_13 = arith.constant 0 : index
    %c0_14 = arith.constant 0 : index
    %9 = vector.load %arg6[%c0_13, %c0_14] : memref<80x1xf32, #tpu.memory_space<vmem>>, vector<16x1xf32>
    %c16 = arith.constant 16 : index
    %c0_15 = arith.constant 0 : index
    %10 = vector.load %arg6[%c16, %c0_15] : memref<80x1xf32, #tpu.memory_space<vmem>>, vector<32x1xf32>
    %c48 = arith.constant 48 : index
    %c0_16 = arith.constant 0 : index
    %11 = vector.load %arg6[%c48, %c0_16] : memref<80x1xf32, #tpu.memory_space<vmem>>, vector<32x1xf32>
    %c0_17 = arith.constant 0 : index
    %c0_18 = arith.constant 0 : index
    %12 = vector.load %arg3[%c0_17, %c0_18] : memref<32x32xf32, #tpu.memory_space<vmem>>, vector<32x32xf32>
    %cst = arith.constant dense<0.000000e+00> : vector<2x32xf32>
    %13 = tpu.matmul %4, %12, %cst {dimension_numbers = #tpu.dot_dimension_numbers<[1], [0], [0], [1], [0, 0, 1, 1], [], []>} : vector<2x32xf32>, vector<32x32xf32>, vector<2x32xf32> -> vector<2x32xf32>
    %14 = vector.broadcast %6 : vector<1x32xf32> to vector<2x32xf32>
    %15 = arith.addf %13, %14 : vector<2x32xf32>
    %cst_19 = arith.constant 0.000000e+00 : f32
    %16 = vector.broadcast %cst_19 : f32 to vector<2x32xf32>
    %17 = arith.maximumf %15, %16 : vector<2x32xf32>
    %c0_20 = arith.constant 0 : index
    %c0_21 = arith.constant 0 : index
    %18 = vector.load %arg4[%c0_20, %c0_21] : memref<16x32xf32, #tpu.memory_space<vmem>>, vector<16x32xf32>
    %cst_22 = arith.constant dense<0.000000e+00> : vector<16x2xf32>
    %19 = tpu.matmul %18, %17, %cst_22 {dimension_numbers = #tpu.dot_dimension_numbers<[1], [1], [0], [0], [0, 0, 1, 0], [], []>} : vector<16x32xf32>, vector<2x32xf32>, vector<16x2xf32> -> vector<16x2xf32>
    %20 = vector.broadcast %9 : vector<16x1xf32> to vector<16x2xf32>
    %21 = arith.addf %19, %20 : vector<16x2xf32>
    %22 = vector.extract_strided_slice %21 {offsets = [0, 0], sizes = [8, 2], strides = [1, 1]} : vector<16x2xf32> to vector<8x2xf32>
    %23 = vector.extract_strided_slice %21 {offsets = [8, 0], sizes = [8, 2], strides = [1, 1]} : vector<16x2xf32> to vector<8x2xf32>
    %cst_23 = arith.constant 5.000000e-01 : f32
    %24 = vector.broadcast %cst_23 : f32 to vector<8x2xf32>
    %25 = arith.mulf %24, %23 : vector<8x2xf32>
    %26 = math.exp %25 : vector<8x2xf32>
    %27 = arith.mulf %5, %26 : vector<8x2xf32>
    %28 = arith.addf %22, %27 : vector<8x2xf32>
    %c0_24 = arith.constant 0 : index
    %c0_25 = arith.constant 0 : index
    %29 = vector.load %arg5[%c0_24, %c0_25] : memref<32x8xf32, #tpu.memory_space<vmem>>, vector<32x8xf32>
    %cst_26 = arith.constant dense<0.000000e+00> : vector<32x2xf32>
    %30 = tpu.matmul %29, %28, %cst_26 {dimension_numbers = #tpu.dot_dimension_numbers<[1], [0], [0], [1], [0, 0, 1, 1], [], []>} : vector<32x8xf32>, vector<8x2xf32>, vector<32x2xf32> -> vector<32x2xf32>
    %cst_27 = arith.constant dense<0.000000e+00> : vector<32x128xf32>
    %31 = tpu.matmul %30, %0, %cst_27 {dimension_numbers = #tpu.dot_dimension_numbers<[1], [0], [0], [1], [0, 0, 1, 1], [], []>} : vector<32x2xf32>, vector<2x128xf32>, vector<32x128xf32> -> vector<32x128xf32>
    %32 = vector.broadcast %10 : vector<32x1xf32> to vector<32x128xf32>
    %33 = arith.addf %31, %32 : vector<32x128xf32>
    %34 = vector.broadcast %11 : vector<32x1xf32> to vector<32x128xf32>
    %35 = vector.broadcast %3 : vector<1x128xf32> to vector<32x128xf32>
    %36 = arith.mulf %34, %35 : vector<32x128xf32>
    %37 = arith.addf %33, %36 : vector<32x128xf32>
    %cst_28 = arith.constant 0.000000e+00 : f32
    %38 = vector.broadcast %cst_28 : f32 to vector<32x128xf32>
    %39 = arith.maximumf %37, %38 : vector<32x128xf32>
    %cst_29 = arith.constant dense<0.000000e+00> : vector<1x128xf32>
    %40 = tpu.matmul %7, %39, %cst_29 {dimension_numbers = #tpu.dot_dimension_numbers<[1], [0], [0], [1], [0, 0, 1, 1], [], []>} : vector<1x32xf32>, vector<32x128xf32>, vector<1x128xf32> -> vector<1x128xf32>
    %41 = vector.broadcast %8 : vector<1x1xf32> to vector<1x128xf32>
    %42 = arith.addf %40, %41 : vector<1x128xf32>
    %43 = arith.mulf %42, %2 : vector<1x128xf32>
    %44 = arith.mulf %1, %2 : vector<1x128xf32>
    %45 = arith.subf %43, %44 : vector<1x128xf32>
    %cst_30 = arith.constant 1.250000e+01 : f32
    %46 = vector.broadcast %cst_30 : f32 to vector<1x128xf32>
    %47 = arith.mulf %46, %45 : vector<1x128xf32>
    %48 = arith.mulf %47, %45 : vector<1x128xf32>
    %49 = arith.mulf %48, %2 : vector<1x128xf32>
    %cst_31 = arith.constant dense<0.000000e+00> : vector<1xf32>
    %50 = vector.multi_reduction <add>, %49, %cst_31 [1] : vector<1x128xf32> to vector<1xf32>
    %51 = vector.shape_cast %50 : vector<1xf32> to vector<1x1xf32>
    %52 = arith.mulf %28, %28 : vector<8x2xf32>
    %53 = arith.subf %52, %23 : vector<8x2xf32>
    %54 = arith.mulf %5, %5 : vector<8x2xf32>
    %55 = arith.subf %53, %54 : vector<8x2xf32>
    %cst_32 = arith.constant 5.000000e-01 : f32
    %56 = vector.broadcast %cst_32 : f32 to vector<8x2xf32>
    %57 = arith.mulf %56, %55 : vector<8x2xf32>
    %cst_33 = arith.constant dense<0.000000e+00> : vector<2xf32>
    %58 = vector.multi_reduction <add>, %57, %cst_33 [0] : vector<8x2xf32> to vector<2xf32>
    %59 = vector.shape_cast %58 : vector<2xf32> to vector<1x2xf32>
    %cst_34 = arith.constant dense<0.000000e+00> : vector<1xf32>
    %60 = vector.multi_reduction <add>, %59, %cst_34 [1] : vector<1x2xf32> to vector<1xf32>
    %61 = vector.shape_cast %60 : vector<1xf32> to vector<1x1xf32>
    %62 = arith.addf %51, %61 : vector<1x1xf32>
    %cst_35 = arith.constant 5.000000e-01 : f32
    %63 = vector.broadcast %cst_35 : f32 to vector<1x1xf32>
    %64 = arith.mulf %62, %63 : vector<1x1xf32>
    %c0_36 = arith.constant 0 : index
    %c0_37 = arith.constant 0 : index
    %65 = vector.load %arg8[%c0_36, %c0_37] : memref<1x1xf32, #tpu.memory_space<vmem>>, vector<1x1xf32>
    tpu.vector_store %arg8[%c0_36, %c0_37], %64 {strides = array<i32>} : memref<1x1xf32, #tpu.memory_space<vmem>>, vector<1x1xf32>,
    return
  }
}

</mosaic_0001>

<bundles_post_ra>
// kernel: tpu_custom_call.1
= control target key start
LH: loop header
LB: loop body
LE: loop exit
PB: predicated region body
PF: predicated region fallthrough
CT: control target
= control target key end

     0   :  { %s547_s0 = inlined_call_operand.vmem [shape: f32[5,128], index: 0, kind: input, shape index: {}]   ;;  %s548_s1 = inlined_call_operand.vmem [shape: f32[2,32], index: 1, kind: input, shape index: {}]   ;;  %s549_s2 = inlined_call_operand.vmem [shape: f32[8,2], index: 2, kind: input, shape index: {}]   ;;  %s550_s3 = inlined_call_operand.vmem [shape: f32[32,32], index: 3, kind: input, shape index: {}]   ;;  %s551_s4 = inlined_call_operand.vmem [shape: f32[16,32], index: 4, kind: input, shape index: {}]   ;;  %s552_s5 = inlined_call_operand.vmem [shape: f32[32,8], index: 5, kind: input, shape index: {}]   ;;  %s553_s6 = inlined_call_operand.vmem [shape: f32[80,1], index: 6, kind: input, shape index: {}]   ;;  %s554_s7 = inlined_call_operand.vmem [shape: f32[3,32], index: 7, kind: input, shape index: {}]   ;;  %s555_s8 = inlined_call_operand.hbm [shape: f32[1,1], index: 8, kind: output, shape index: {}]  }
   0x1   :  { %v52_v0 = vld [vmem:[%s550_s3 + $0x18] sm:$0xff]  ;;  %v51_v1 = vld [vmem:[%s550_s3 + $0x10] sm:$0xff]  ;;  %v50_v2 = vld [vmem:[%s550_s3 + $0x8] sm:$0xff] }
   0x2   :  { %70 = vmatpush.msra.mxu0 %v52_v0 }
   0x3   :  { %13 = vsyncpa [#allocation3], 0  ;;  %v49_v3 = vld [vmem:[%s550_s3] sm:$0xff]  ;;  %vm54_vm0 = vcmask 261120   ;;  %v395_v5 = vmov 0   ;;  %v40_v6 = vld [vmem:[%s553_s6 + $0x8] sm:$0xff] }
   0x4   :  { %71 = vmatpush.msra.mxu0 %v51_v1  ;;  %v34_v4 = vld [vmem:[%s548_s1] sm:$0x3]  ;;  %362 = vset.pattern.permute.xlu0 %v395_v5  ;;  %v42_v8 = vld [vmem:[%s553_s6 + $0x18] sm:$0xff]  ;;  %v45_v9 = vld [vmem:[%s553_s6 + $0x30] sm:$0xff]  ;;  %vm132_vm1 = vcmask 64512   ;;  %vm194_vm2 = vcmask 15360  }
   0x5   :  { %363 = vset.pattern.permute.xlu1 %v395_v5  ;;  %88 = vperm.xlu0 %362, %v40_v6   ;;  %v39_v7 = vld [vmem:[%s553_s6] sm:$0xff]  ;;  %v80_v15 = vld [vmem:[%s551_s4 + $0x8] sm:$0xff]  ;;  %v130_v39 = vld [vmem:[%s552_s5 + $0x10] sm:$0xff]  ;;  %vm207_vm3 = vcmask 1041408   ;;  %vm307_vm4 = vcmask 1040384   ;;  %vm328_vm5 = vcmask 0  }
   0x6   :  { %72 = vmatpush.msra.mxu0 %v50_v2  ;;  %364 = vset.pattern.permute.xlu2 %v395_v5  ;;  %v365_v10 = vld [vmem:[%s554_s7] ss:$0 sm:$0xff]  ;;  %v129_v34 = vld [vmem:[%s552_s5 + $0x8] sm:$0xff]  ;;  %v131_v44 = vld [vmem:[%s552_s5 + $0x18] sm:$0xff] }
   0x7   :  { %v79_v14 = vld [vmem:[%s551_s4] sm:$0xff]  ;;  %v44_v46 = vld [vmem:[%s553_s6 + $0x28] sm:$0xff]  ;;  %v46_v48 = vld [vmem:[%s553_s6 + $0x38] sm:$0xff] }
   0x8   :  { %73 = vmatpush.msra.mxu0 %v49_v3  ;;  %v35_v22 = vld [vmem:[%s549_s2] sm:$0xff]  ;;  %191 = vperm.xlu1 %363, %v44_v46   ;;  %v48_v47 = vld [vmem:[%s553_s6 + $0x48] sm:$0xff]  ;;  %v41_v53 = vld [vmem:[%s553_s6 + $0x10] sm:$0xff] }
   0x9   :  { %346 = vmatmul.msk.f32.vlgmr.msra.gmra.mxu0 %vm54_vm0, %v34_v4  ;;  %v128_v28 = vld [vmem:[%s552_s5] sm:$0xff]  ;;  %v313_v30 = vmul.f32 %v35_v22, %v35_v22 }
   0xa   :  { %v30_v45 = vld [vmem:[%s547_s0] sm:$0x3]  ;;  %v38_v50 = vld [vmem:[%s554_s7 + $0x2] sm:$0x1]  ;;  %v366_v1 = vld [vmem:[%s547_s0 + $0x4] ss:$0 sm:$0xff] }
   0xb   :  { %354 = vmatpush.msk.msra.mxu3 %vm207_vm3, %v30_v45  ;;  %v43_v49 = vld [vmem:[%s553_s6 + $0x20] sm:$0xff] }
   0xc   :  { %186 = vperm.xlu2 %364, %v43_v49   ;;  %v47_v51 = vld [vmem:[%s553_s6 + $0x40] sm:$0xff] }
   0xd   :  { %83 = vperm.xlu0 %362, %v39_v7  }
  0x10   :  { %257 = vperm.xlu1 %363, %v48_v47  }
  0x14   :  { %252 = vperm.xlu2 %364, %v47_v51  }
  0x15   :  { %181 = vperm.xlu0 %362, %v42_v8  }
  0x18   :  { %247 = vperm.xlu1 %363, %v46_v48  }
  0x1c   :  { %176 = vperm.xlu2 %364, %v41_v53  }
  0x1d   :  { %242 = vperm.xlu0 %362, %v45_v9  }
  0x20   :  { %275 = vperm.xlu1 %363, %v38_v50  }
  0x66   :  { %v187_v58 = vpop.permute.xlu2 %186 }
  0x6e   :  { %v253_v61 = vpop.permute.xlu2 %252 }
  0x6f   :  { %v263_v4 = vmul.f32 %v366_v1, %v253_v61 }
  0x76   :  { %v177_v2 = vpop.permute.xlu2 %176 }
  0x77   :  { %v89_v17 = vpop.permute.xlu0 %88 }
  0x7a   :  { %v192_v59 = vpop.permute.xlu1 %191 }
  0x7f   :  { %v84_v24 = vpop.permute.xlu0 %83 }
  0x82   :  { %v258_v62 = vpop.permute.xlu1 %257 }
  0x83   :  { %v264_v7 = vmul.f32 %v366_v1, %v258_v62 }
  0x86   :  { %v75_v11 = vpop.f32.mrf.mxu0 }
  0x87   :  { %v76_v12 = vadd.f32 %v365_v10, %v75_v11  ;;  %v182_v63 = vpop.permute.xlu0 %181 }
  0x89   :  { %v78_v13 = vmax.f32 %v76_v12, 0.0 }
  0x8a   :  { %v248_v5 = vpop.permute.xlu1 %247 }
  0x8b   :  { %347 = vmatpush.xpose.msk.msra.mxu1 %vm54_vm0, %v78_v13  ;;  %v262_v8 = vmul.f32 %v366_v1, %v248_v5 }
  0x8e   :  { %348 = vmatmul.msk.f32.vlgmr.msra.gmra.mxu1 %vm54_vm0, %v79_v14 }
  0x8f   :  { %v243_v11 = vpop.permute.xlu0 %242 }
  0x96   :  { %349 = vmatmul.msk.f32.gmra.mxu1 %vm54_vm0, %v80_v15  ;;  %v261_v15 = vmul.f32 %v366_v1, %v243_v11 }
 0x10b   :  { %v117_v16 = vpop.f32.mrf.mxu1 }
 0x10c   :  { %v118_v25 = vadd.f32 %v117_v16, %v84_v24  ;;  %v32_v24 = vld [vmem:[%s547_s0 + $0x3] sm:$0x1] }
 0x113   :  { %v120_v18 = vpop.f32.mrf.mxu1 }
 0x114   :  { %v121_v19 = vadd.f32 %v120_v18, %v89_v17 }
 0x116   :  { %v123_v20 = vmul.f32 0.5, %v121_v19 }
 0x118   :  { %v124_v21 = vmul.f32 1.442695, %v123_v20 }
 0x11a   :  { %367 = vpow2.f32 %v124_v21 }
 0x120   :  { %v368_v23 = vpop.eup %367 }
 0x121   :  { %v126_v26 = vmul.f32 %v368_v23, %v35_v22  ;;  %v37_v22 = vld [vmem:[%s554_s7 + $0x1] sm:$0x1]  ;;  %v31_v23 = vld [vmem:[%s547_s0 + $0x2] sm:$0x1]  ;;  %s396_s7 = smov [#allocation2]   ;;  %s337_s0 = sshll.u32 %s555_s8, 4  ;;  %s338_s0 = int_to_ptr.hbm [resolvable:$true] %s337_s0 }
 0x122   :  { %s335_s9 = sshll.u32 %s396_s7, 4  ;;  %s336_s9 = int_to_ptr.vmem [resolvable:$true] %s335_s9 }
 0x123   :  { %v127_v27 = vadd.f32 %v126_v26, %v118_v25  ;;  %v276_v25 = vpop.permute.xlu1 %275 }
 0x125   :  { %160 = vmatpush.msra.mxu2 %v127_v27  ;;  %v311_v29 = vmul.f32 %v127_v27, %v127_v27 }
 0x126   :  { %350 = vmatmul.msk.f32.vlgmr.msra.gmra.mxu2 %vm132_vm1, %v128_v28  ;;  %v302_v28 = vmul.f32 %v32_v24, %v31_v23 }
 0x127   :  { %v312_v31 = vsub.f32 %v311_v29, %v121_v19 }
 0x129   :  { %v314_v32 = vsub.f32 %v312_v31, %v313_v30 }
 0x12b   :  { %v315_v33 = vmul.f32 0.5, %v314_v32 }
 0x12d   :  { %v316_v35 = vsel %vm194_vm2, %v315_v33, 0.0 }
 0x12e   :  { %351 = vmatmul.msk.f32.gmra.mxu2 %vm132_vm1, %v129_v34  ;;  %v317_v36 = vrot.slane %v316_v35, 4 }
 0x130   :  { %v318_v37 = vadd.f32 %v317_v36, %v316_v35 }
 0x132   :  { %v319_v38 = vrot.slane %v318_v37, 2 }
 0x134   :  { %v320_v40 = vadd.f32 %v319_v38, %v318_v37 }
 0x136   :  { %352 = vmatmul.msk.f32.gmra.mxu2 %vm132_vm1, %v130_v39  ;;  %v321_v41 = vrot.slane %v320_v40, 1 }
 0x138   :  { %v322_v42 = vadd.f32 %v321_v41, %v320_v40 }
 0x13a   :  { %v323_v43 = vsel %vm194_vm2, %v322_v42, 0.0 }
 0x13b   :  { %324 = vadd.xlane.f32.xlu0 %v323_v43 }
 0x13e   :  { %353 = vmatmul.msk.f32.gmra.mxu2 %vm132_vm1, %v131_v44 }
 0x1a9   :  { %v162_v52 = vpop.f32.mrf.mxu2 }
 0x1aa   :  { %355 = vmatmul.msk.f32.vlgmr.msra.gmra.mxu3 %vm194_vm2, %v162_v52 }
 0x1ae   :  { %v325_v35 = vpop.xlane.xlu0 %324 }
 0x1b1   :  { %v165_v54 = vpop.f32.mrf.mxu2 }
 0x1b2   :  { %356 = vmatmul.msk.f32.gmra.mxu3 %vm194_vm2, %v165_v54 }
 0x1b9   :  { %v168_v55 = vpop.f32.mrf.mxu2 }
 0x1ba   :  { %357 = vmatmul.msk.f32.gmra.mxu3 %vm194_vm2, %v168_v55 }
 0x1c1   :  { %v171_v56 = vpop.f32.mrf.mxu2 }
 0x1c2   :  { %358 = vmatmul.msk.f32.gmra.mxu3 %vm194_vm2, %v171_v56 }
 0x22d   :  { %v228_v57 = vpop.f32.mrf.mxu3 }
 0x22e   :  { %v229_v12 = vadd.f32 %v228_v57, %v177_v2 }
 0x230   :  { %v265_v19 = vadd.f32 %v261_v15, %v229_v12 }
 0x232   :  { %v269_v21 = vmax.f32 %v265_v19, 0.0 }
 0x235   :  { %v231_v60 = vpop.f32.mrf.mxu3 }
 0x236   :  { %v232_v9 = vadd.f32 %v231_v60, %v182_v63 }
 0x238   :  { %v266_v17 = vadd.f32 %v262_v8, %v232_v9 }
 0x23a   :  { %v270_v20 = vmax.f32 %v266_v17, 0.0 }
 0x23d   :  { %v234_v0 = vpop.f32.mrf.mxu3 }
 0x23e   :  { %v235_v3 = vadd.f32 %v234_v0, %v187_v58 }
 0x240   :  { %v267_v14 = vadd.f32 %v263_v4, %v235_v3 }
 0x242   :  { %v271_v18 = vmax.f32 %v267_v14, 0.0 }
 0x245   :  { %v237_v6 = vpop.f32.mrf.mxu3 }
 0x246   :  { %v238_v10 = vadd.f32 %v237_v6, %v192_v59 }
 0x248   :  { %v268_v13 = vadd.f32 %v264_v7, %v238_v10 }
 0x24a   :  { %v272_v16 = vmax.f32 %v268_v13, 0.0 }
 0x24c   :  { %293 = vmatpush.msrb.mxu0 %v272_v16 }
 0x24e   :  { %294 = vmatpush.msrb.mxu0 %v271_v18 }
 0x250   :  { %295 = vmatpush.msrb.mxu0 %v270_v20 }
 0x252   :  { %296 = vmatpush.msrb.mxu0 %v269_v21 }
 0x253   :  { %359 = vmatmul.msk.f32.vlgmr.msrb.gmra.mxu0 %vm54_vm0, %v37_v22 }
 0x2d0   :  { %v298_v26 = vpop.f32.mrf.mxu0 }
 0x2d1   :  { %v299_v27 = vadd.f32 %v298_v26, %v276_v25 }
 0x2d3   :  { %v301_v29 = vmul.f32 %v299_v27, %v32_v24 }
 0x2d5   :  { %v303_v30 = vsub.f32 %v301_v29, %v302_v28 }
 0x2d7   :  { %v304_v31 = vmul.f32 12.5, %v303_v30 }
 0x2d9   :  { %v305_v32 = vmul.f32 %v304_v31, %v303_v30 }
 0x2db   :  { %v306_v33 = vmul.f32 %v305_v32, %v32_v24 }
 0x2dd   :  { %v308_v34 = vsel %vm307_vm4, %v306_v33, 0.0 }
 0x2de   :  { %309 = vadd.xlane.f32.xlu2 %v308_v34 }
 0x351   :  { %v310_v36 = vpop.xlane.xlu2 %309 }
 0x352   :  { %v326_v37 = vadd.f32 %v325_v35, %v310_v36 }
 0x354   :  { %v327_v38 = vmul.f32 0.5, %v326_v37 }
 0x356   :  { %329 = vst.msk [vmem:[#allocation2] sm:$0x1] %vm328_vm5, %v327_v38 }
 0x357   :  { %340 = dma.vmem_to_hbm [thread:$0]  %s336_s9, 16, %s338_s0, [#allocation3]  }
 0x358   :  { %393 = dma.done.wait [#allocation3], 16  }
 0x359   :  { %394 = vsyncadd [#allocation3], 4294967280 }
 0x35a   :  { %345 = vsyncpa [#allocation3], 1 }

</bundles_post_ra>
